<compile_context>
chip_gen: v7x
topology: tpu7x:2x2x1
jax: 0.10.0
libtpu: 0.0.40
codegen_flags: <defaults>
</compile_context>

<pallas_src>
import functools
import math

import jax
import jax.numpy as jnp
from jax.experimental import pallas as pl
from jax.experimental.pallas import tpu as pltpu

MARGIN = 0.0                 # torch.tensor(0)
VAR_PRIOR = 1.0 / 96.0       # varPrior
KL_SCALE = 1e-6              # kl_scale_factor
_LOG_VAR_PRIOR = math.log(VAR_PRIOR)
_INV_SQRT2 = 1.0 / math.sqrt(2.0)


def _std_normal_cdf(x):
    # Normal(loc=mu, scale=sigma).cdf(m) == Phi((m - mu)/sigma)
    return 0.5 * (1.0 + jax.lax.erf(x * _INV_SQRT2))


def _btl_kernel(muA_ref, muP_ref, muN_ref, varA_ref, varP_ref, varN_ref,
                out_ref, acc_ref, *, n_true, d, tile_n, needs_mask):
    i = pl.program_id(0)

    @pl.when(i == 0)
    def _init():
        acc_ref[...] = jnp.zeros_like(acc_ref)

    f32 = jnp.float32
    muA = muA_ref[...].astype(f32)
    muP = muP_ref[...].astype(f32)
    muN = muN_ref[...].astype(f32)
    varA = varA_ref[...].astype(f32)
    varP = varP_ref[...].astype(f32)
    varN = varN_ref[...].astype(f32)

    muA2 = muA * muA
    muP2 = muP * muP
    muN2 = muN * muN
    vmA = varA + muA2
    vmP = varP + muP2
    vmN = varN + muN2

    def rowsum(x):                       # reduce over embedding (lane) dim
        return jnp.sum(x, axis=-1, keepdims=True)   # (tile_n, 1)

    # --- negative_loglikelihood (fused) -------------------------------------
    sPP = rowsum(vmP)
    sNN = rowsum(vmN)
    sAA = rowsum(vmA)
    mu_rows = sPP - sNN - 2.0 * rowsum(muA * (muP - muN))

    # inner = T1 + T2 - T3 with the shared 2*(varA+muA^2)*(..) term factored;
    # the overall factor 2 is applied after the lane reduction.
    inner = (varP * varP + varN * varN
             + 2.0 * (muP2 * varP + muN2 * varN)
             + 2.0 * vmA * (vmP + vmN)
             - 2.0 * muA2 * (muP2 + muN2)
             - 4.0 * muA * (muP * varP + muN * varN)
             - 4.0 * (muP * muN) * varA)
    sigma2_rows = 2.0 * rowsum(inner)
    sigma_rows = jnp.sqrt(sigma2_rows + 1e-7)

    probs_rows = _std_normal_cdf((MARGIN - mu_rows) / (sigma_rows + 1e-8))
    nll_rows = -jnp.log(probs_rows + 1e-8)

    # --- KL partial sums (reduced form, no (N,D) broadcast tensor) ----------
    s1_rows = sAA + sPP + sNN                                   # sum(var + mu^2)
    s2_rows = rowsum(jnp.log(varA) + jnp.log(varP) + jnp.log(varN))

    if needs_mask:
        row_ids = i * tile_n + jax.lax.broadcasted_iota(jnp.int32, (tile_n, 1), 0)
        m = (row_ids < n_true).astype(f32)
        nll_rows = nll_rows * m
        probs_rows = probs_rows * m
        mu_rows = mu_rows * m
        sigma_rows = sigma_rows * m
        s1_rows = s1_rows * m
        s2_rows = s2_rows * m

    def colsum(x):
        return jnp.sum(x, axis=0, keepdims=True)    # (1, 1)

    acc_ref[:, 0:1] += colsum(nll_rows)
    acc_ref[:, 1:2] += colsum(probs_rows)
    acc_ref[:, 2:3] += colsum(mu_rows)
    acc_ref[:, 3:4] += colsum(sigma_rows)
    acc_ref[:, 4:5] += colsum(s1_rows)
    acc_ref[:, 5:6] += colsum(s2_rows)

    @pl.when(i == pl.num_programs(0) - 1)
    def _finalize():
        acc = acc_ref[...]
        inv_n = 1.0 / float(n_true)
        nll_mean = acc[0, 0] * inv_n
        probs_mean = acc[0, 1] * inv_n
        mu_mean = acc[0, 2] * inv_n
        sigma_mean = acc[0, 3] * inv_n
        # Sum over the three kl_div_gauss terms, reduced form.
        kl = 0.5 * (acc[0, 4] * (inv_n / VAR_PRIOR)
                    - 3.0 * float(d)
                    + 3.0 * float(d) * _LOG_VAR_PRIOR
                    - acc[0, 5] * inv_n)
        out_ref[0, 0] = nll_mean + KL_SCALE * kl
        out_ref[0, 1] = probs_mean
        out_ref[0, 2] = mu_mean
        out_ref[0, 3] = sigma_mean


def _choose_tiling(n, d):
    """Generation-aware batch tile: biggest tile whose 6x double-buffered f32
    input blocks fit comfortably in this chip's VMEM."""
    try:
        vmem_cap = int(pltpu.get_tpu_info().vmem_capacity_bytes)
    except Exception:
        vmem_cap = 64 * 1024 * 1024          # conservative (v7x per-TC)
    budget = (vmem_cap * 3) // 8             # headroom for scratch / compiler
    bytes_per_row = 6 * 2 * d * 4            # 6 inputs x 2 pipeline bufs x f32
    tile = budget // max(bytes_per_row, 1)
    tile = int(max(8, min(tile, 2048)))
    tile = (tile // 8) * 8
    n_min = max(n, 8)
    if tile >= n_min:
        tile = ((n_min + 7) // 8) * 8        # single tile covers (padded) batch
    num_tiles = -(-n_min // tile)
    n_pad = num_tiles * tile
    inbuf_bytes = 6 * 2 * tile * d * 4
    vmem_limit = int(min(vmem_cap * 7 // 8,
                         max(inbuf_bytes * 2, 32 * 1024 * 1024)))
    return tile, num_tiles, n_pad, vmem_limit


def bayesian_triplet_loss(muA, muP, muN, varA, varP, varN):
    """All inputs (N, D) floats. Returns (loss, probs_mean, mu_mean, sigma_mean)."""
    n, d = muA.shape
    tile_n, num_tiles, n_pad, vmem_limit = _choose_tiling(n, d)

    pad = n_pad - n
    if pad:
        # Safe padding (mu=0, var=1) so logs/sqrts stay finite; padded rows are
        # masked out inside the kernel so means are unbiased.
        def _pad_mu(a):
            return jnp.pad(a, ((0, pad), (0, 0)))

        def _pad_var(a):
            return jnp.pad(a, ((0, pad), (0, 0)), constant_values=1.0)

        muA, muP, muN = _pad_mu(muA), _pad_mu(muP), _pad_mu(muN)
        varA, varP, varN = _pad_var(varA), _pad_var(varP), _pad_var(varN)

    kernel = functools.partial(_btl_kernel, n_true=n, d=d, tile_n=tile_n,
                               needs_mask=(pad != 0))

    in_block = lambda: pl.BlockSpec((tile_n, d), lambda i: (i, 0))
    grid_spec = pltpu.PrefetchScalarGridSpec(
        num_scalar_prefetch=0,
        grid=(num_tiles,),
        in_specs=[in_block() for _ in range(6)],
        out_specs=pl.BlockSpec((1, 4), lambda i: (0, 0),
                               memory_space=pltpu.MemorySpace.SMEM),
        scratch_shapes=[pltpu.VMEM((1, 8), jnp.float32)],
    )

    out = pl.pallas_call(
        kernel,
        out_shape=jax.ShapeDtypeStruct((1, 4), jnp.float32),
        grid_spec=grid_spec,
        compiler_params=pltpu.CompilerParams(
            dimension_semantics=("arbitrary",),   # running-sum accumulation
            vmem_limit_bytes=vmem_limit,
        ),
    )(muA, muP, muN, varA, varP, varN)
    return out[0, 0], out[0, 1], out[0, 2], out[0, 3]


# ---------------------------------------------------------------------------
# Pure-JAX reference mirroring the PyTorch code literally (with transposes),
# used only to sanity-check the kernel.
# ---------------------------------------------------------------------------
def _reference(muA, muP, muN, varA, varP, varN):
    muA, muP, muN, varA, varP, varN = (a.T for a in (muA, muP, muN, varA, varP, varN))
    D = muA.shape[0]

    mu = jnp.sum(muP**2 + varP - muN**2 - varN - 2 * muA * (muP - muN), axis=0)
    T1 = (varP**2 + 2 * muP**2 * varP + 2 * (varA + muA**2) * (varP + muP**2)
          - 2 * muA**2 * muP**2 - 4 * muA * muP * varP)
    T2 = (varN**2 + 2 * muN**2 * varN + 2 * (varA + muA**2) * (varN + muN**2)
          - 2 * muA**2 * muN**2 - 4 * muA * muN * varN)
    T3 = 4 * muP * muN * varA
    sigma2 = jnp.sum(2 * T1 + 2 * T2 - 2 * T3, axis=0)
    sigma = jnp.sqrt(sigma2 + 1e-7)
    probs = 0.5 * (1.0 + jax.lax.erf((MARGIN - mu) / ((sigma + 1e-8) * math.sqrt(2.0))))
    nll = -jnp.log(probs + 1e-8)

    def kl_gauss(mu_q, var_q):
        sumsq = jnp.sum(mu_q**2, axis=0)
        kl = 0.5 * (var_q / VAR_PRIOR * D + (1.0 / VAR_PRIOR) * sumsq - D
                    + D * (math.log(VAR_PRIOR) - jnp.log(var_q)))
        return jnp.mean(kl)

    kl = kl_gauss(muA, varA) + kl_gauss(muP, varP) + kl_gauss(muN, varN)
    return (jnp.mean(nll) + KL_SCALE * kl, jnp.mean(probs), jnp.mean(mu), jnp.mean(sigma))


if __name__ == "__main__":
    N, D = 8, 32  # batch, embedding dim
    key = jax.random.PRNGKey(0)
    kA, kP, kN, kvA, kvP, kvN = jax.random.split(key, 6)

    muA = jax.random.normal(kA, (N, D), dtype=jnp.float32) * 0.1
    muP = jax.random.normal(kP, (N, D), dtype=jnp.float32) * 0.1
    muN = jax.random.normal(kN, (N, D), dtype=jnp.float32) * 0.1
    varA = jax.random.uniform(kvA, (N, D), dtype=jnp.float32, minval=0.005, maxval=0.05)
    varP = jax.random.uniform(kvP, (N, D), dtype=jnp.float32, minval=0.005, maxval=0.05)
    varN = jax.random.uniform(kvN, (N, D), dtype=jnp.float32, minval=0.005, maxval=0.05)

    loss, probs_m, mu_m, sigma_m = bayesian_triplet_loss(muA, muP, muN, varA, varP, varN)
    jax.block_until_ready((loss, probs_m, mu_m, sigma_m))

    ref = _reference(muA, muP, muN, varA, varP, varN)
    for got, want in zip((loss, probs_m, mu_m, sigma_m), ref):
        assert jnp.allclose(got, want, rtol=2e-4, atol=2e-5), (got, want)

    print("KERNEL_OK")
</pallas_src>

<mosaic_0001>
module attributes {stable_mosaic.version = 11 : i64} {
  func.func @_btl_kernel(%arg0: i32, %arg1: memref<8x32xf32, #tpu.memory_space<vmem>>, %arg2: memref<8x32xf32, #tpu.memory_space<vmem>>, %arg3: memref<8x32xf32, #tpu.memory_space<vmem>>, %arg4: memref<8x32xf32, #tpu.memory_space<vmem>>, %arg5: memref<8x32xf32, #tpu.memory_space<vmem>>, %arg6: memref<8x32xf32, #tpu.memory_space<vmem>>, %arg7: memref<1x4xf32, #tpu.memory_space<smem>>, %arg8: memref<1x8xf32, #tpu.memory_space<vmem>>) attributes {dimension_semantics = [#tpu.dimension_semantics<arbitrary>], iteration_bounds = array<i64: 1>, scalar_prefetch = 0 : i64, scratch_operands = 1 : i64, tpu.core_type = #tpu.core_type<tc>, window_params = [{transform_indices = @transform_0, window_bounds = array<i64: 8, 32>}, {transform_indices = @transform_1, window_bounds = array<i64: 8, 32>}, {transform_indices = @transform_2, window_bounds = array<i64: 8, 32>}, {transform_indices = @transform_3, window_bounds = array<i64: 8, 32>}, {transform_indices = @transform_4, window_bounds = array<i64: 8, 32>}, {transform_indices = @transform_5, window_bounds = array<i64: 8, 32>}, {transform_indices = @transform_6, window_bounds = array<i64: 1, 4>}]} {
    %c0_i32 = arith.constant 0 : i32
    %0 = arith.cmpi eq, %arg0, %c0_i32 : i32
    %1 = arith.extui %0 : i1 to i32
    %c0_i32_0 = arith.constant 0 : i32
    %2 = arith.cmpi ne, %1, %c0_i32_0 : i32
    scf.if %2 {
      %cst_59 = arith.constant 0.000000e+00 : f32
      %126 = vector.broadcast %cst_59 : f32 to vector<1x8xf32>
      %c0_60 = arith.constant 0 : index
      %c0_61 = arith.constant 0 : index
      %127 = vector.load %arg8[%c0_60, %c0_61] : memref<1x8xf32, #tpu.memory_space<vmem>>, vector<1x8xf32>
      tpu.vector_store %arg8[%c0_60, %c0_61], %126 {strides = array<i32>} : memref<1x8xf32, #tpu.memory_space<vmem>>, vector<1x8xf32>,
    } else {
    }
    %c0 = arith.constant 0 : index
    %c0_1 = arith.constant 0 : index
    %3 = vector.load %arg1[%c0, %c0_1] : memref<8x32xf32, #tpu.memory_space<vmem>>, vector<8x32xf32>
    %c0_2 = arith.constant 0 : index
    %c0_3 = arith.constant 0 : index
    %4 = vector.load %arg2[%c0_2, %c0_3] : memref<8x32xf32, #tpu.memory_space<vmem>>, vector<8x32xf32>
    %c0_4 = arith.constant 0 : index
    %c0_5 = arith.constant 0 : index
    %5 = vector.load %arg3[%c0_4, %c0_5] : memref<8x32xf32, #tpu.memory_space<vmem>>, vector<8x32xf32>
    %c0_6 = arith.constant 0 : index
    %c0_7 = arith.constant 0 : index
    %6 = vector.load %arg4[%c0_6, %c0_7] : memref<8x32xf32, #tpu.memory_space<vmem>>, vector<8x32xf32>
    %c0_8 = arith.constant 0 : index
    %c0_9 = arith.constant 0 : index
    %7 = vector.load %arg5[%c0_8, %c0_9] : memref<8x32xf32, #tpu.memory_space<vmem>>, vector<8x32xf32>
    %c0_10 = arith.constant 0 : index
    %c0_11 = arith.constant 0 : index
    %8 = vector.load %arg6[%c0_10, %c0_11] : memref<8x32xf32, #tpu.memory_space<vmem>>, vector<8x32xf32>
    %9 = arith.mulf %3, %3 : vector<8x32xf32>
    %10 = arith.mulf %4, %4 : vector<8x32xf32>
    %11 = arith.mulf %5, %5 : vector<8x32xf32>
    %12 = arith.addf %6, %9 : vector<8x32xf32>
    %13 = arith.addf %7, %10 : vector<8x32xf32>
    %14 = arith.addf %8, %11 : vector<8x32xf32>
    %cst = arith.constant dense<0.000000e+00> : vector<8xf32>
    %15 = vector.multi_reduction <add>, %13, %cst [1] : vector<8x32xf32> to vector<8xf32>
    %16 = vector.shape_cast %15 : vector<8xf32> to vector<8x1xf32>
    %cst_12 = arith.constant dense<0.000000e+00> : vector<8xf32>
    %17 = vector.multi_reduction <add>, %14, %cst_12 [1] : vector<8x32xf32> to vector<8xf32>
    %18 = vector.shape_cast %17 : vector<8xf32> to vector<8x1xf32>
    %cst_13 = arith.constant dense<0.000000e+00> : vector<8xf32>
    %19 = vector.multi_reduction <add>, %12, %cst_13 [1] : vector<8x32xf32> to vector<8xf32>
    %20 = vector.shape_cast %19 : vector<8xf32> to vector<8x1xf32>
    %21 = arith.subf %16, %18 : vector<8x1xf32>
    %22 = arith.subf %4, %5 : vector<8x32xf32>
    %23 = arith.mulf %3, %22 : vector<8x32xf32>
    %cst_14 = arith.constant dense<0.000000e+00> : vector<8xf32>
    %24 = vector.multi_reduction <add>, %23, %cst_14 [1] : vector<8x32xf32> to vector<8xf32>
    %25 = vector.shape_cast %24 : vector<8xf32> to vector<8x1xf32>
    %cst_15 = arith.constant 2.000000e+00 : f32
    %26 = vector.broadcast %cst_15 : f32 to vector<8x1xf32>
    %27 = arith.mulf %26, %25 : vector<8x1xf32>
    %28 = arith.subf %21, %27 : vector<8x1xf32>
    %29 = arith.mulf %7, %7 : vector<8x32xf32>
    %30 = arith.mulf %8, %8 : vector<8x32xf32>
    %31 = arith.addf %29, %30 : vector<8x32xf32>
    %32 = arith.mulf %10, %7 : vector<8x32xf32>
    %33 = arith.mulf %11, %8 : vector<8x32xf32>
    %34 = arith.addf %32, %33 : vector<8x32xf32>
    %cst_16 = arith.constant 2.000000e+00 : f32
    %35 = vector.broadcast %cst_16 : f32 to vector<8x32xf32>
    %36 = arith.mulf %35, %34 : vector<8x32xf32>
    %37 = arith.addf %31, %36 : vector<8x32xf32>
    %cst_17 = arith.constant 2.000000e+00 : f32
    %38 = vector.broadcast %cst_17 : f32 to vector<8x32xf32>
    %39 = arith.mulf %38, %12 : vector<8x32xf32>
    %40 = arith.addf %13, %14 : vector<8x32xf32>
    %41 = arith.mulf %39, %40 : vector<8x32xf32>
    %42 = arith.addf %37, %41 : vector<8x32xf32>
    %cst_18 = arith.constant 2.000000e+00 : f32
    %43 = vector.broadcast %cst_18 : f32 to vector<8x32xf32>
    %44 = arith.mulf %43, %9 : vector<8x32xf32>
    %45 = arith.addf %10, %11 : vector<8x32xf32>
    %46 = arith.mulf %44, %45 : vector<8x32xf32>
    %47 = arith.subf %42, %46 : vector<8x32xf32>
    %cst_19 = arith.constant 4.000000e+00 : f32
    %48 = vector.broadcast %cst_19 : f32 to vector<8x32xf32>
    %49 = arith.mulf %48, %3 : vector<8x32xf32>
    %50 = arith.mulf %4, %7 : vector<8x32xf32>
    %51 = arith.mulf %5, %8 : vector<8x32xf32>
    %52 = arith.addf %50, %51 : vector<8x32xf32>
    %53 = arith.mulf %49, %52 : vector<8x32xf32>
    %54 = arith.subf %47, %53 : vector<8x32xf32>
    %55 = arith.mulf %4, %5 : vector<8x32xf32>
    %cst_20 = arith.constant 4.000000e+00 : f32
    %56 = vector.broadcast %cst_20 : f32 to vector<8x32xf32>
    %57 = arith.mulf %56, %55 : vector<8x32xf32>
    %58 = arith.mulf %57, %6 : vector<8x32xf32>
    %59 = arith.subf %54, %58 : vector<8x32xf32>
    %cst_21 = arith.constant dense<0.000000e+00> : vector<8xf32>
    %60 = vector.multi_reduction <add>, %59, %cst_21 [1] : vector<8x32xf32> to vector<8xf32>
    %61 = vector.shape_cast %60 : vector<8xf32> to vector<8x1xf32>
    %cst_22 = arith.constant 2.000000e+00 : f32
    %62 = vector.broadcast %cst_22 : f32 to vector<8x1xf32>
    %63 = arith.mulf %62, %61 : vector<8x1xf32>
    %cst_23 = arith.constant 1.000000e-07 : f32
    %64 = vector.broadcast %cst_23 : f32 to vector<8x1xf32>
    %65 = arith.addf %63, %64 : vector<8x1xf32>
    %66 = math.sqrt %65 : vector<8x1xf32>
    %cst_24 = arith.constant 0.000000e+00 : f32
    %67 = vector.broadcast %cst_24 : f32 to vector<8x1xf32>
    %68 = arith.subf %67, %28 : vector<8x1xf32>
    %cst_25 = arith.constant 9.99999993E-9 : f32
    %69 = vector.broadcast %cst_25 : f32 to vector<8x1xf32>
    %70 = arith.addf %66, %69 : vector<8x1xf32>
    %71 = arith.divf %68, %70 : vector<8x1xf32>
    %cst_26 = arith.constant 0.707106769 : f32
    %72 = vector.broadcast %cst_26 : f32 to vector<8x1xf32>
    %73 = arith.mulf %71, %72 : vector<8x1xf32>
    %74 = math.erf %73 : vector<8x1xf32>
    %cst_27 = arith.constant 1.000000e+00 : f32
    %75 = vector.broadcast %cst_27 : f32 to vector<8x1xf32>
    %76 = arith.addf %75, %74 : vector<8x1xf32>
    %cst_28 = arith.constant 5.000000e-01 : f32
    %77 = vector.broadcast %cst_28 : f32 to vector<8x1xf32>
    %78 = arith.mulf %77, %76 : vector<8x1xf32>
    %cst_29 = arith.constant 9.99999993E-9 : f32
    %79 = vector.broadcast %cst_29 : f32 to vector<8x1xf32>
    %80 = arith.addf %78, %79 : vector<8x1xf32>
    %81 = math.log %80 : vector<8x1xf32>
    %cst_30 = arith.constant 0.000000e+00 : f32
    %82 = vector.broadcast %cst_30 : f32 to vector<8x1xf32>
    %83 = arith.subf %82, %81 : vector<8x1xf32>
    %84 = arith.addf %20, %16 : vector<8x1xf32>
    %85 = arith.addf %84, %18 : vector<8x1xf32>
    %86 = math.log %6 : vector<8x32xf32>
    %87 = math.log %7 : vector<8x32xf32>
    %88 = arith.addf %86, %87 : vector<8x32xf32>
    %89 = math.log %8 : vector<8x32xf32>
    %90 = arith.addf %88, %89 : vector<8x32xf32>
    %cst_31 = arith.constant dense<0.000000e+00> : vector<8xf32>
    %91 = vector.multi_reduction <add>, %90, %cst_31 [1] : vector<8x32xf32> to vector<8xf32>
    %92 = vector.shape_cast %91 : vector<8xf32> to vector<8x1xf32>
    %c0_32 = arith.constant 0 : index
    %c0_33 = arith.constant 0 : index
    %93 = vector.load %arg8[%c0_32, %c0_33] : memref<1x8xf32, #tpu.memory_space<vmem>>, vector<1x1xf32>
    %cst_34 = arith.constant dense<0.000000e+00> : vector<1xf32>
    %94 = vector.multi_reduction <add>, %83, %cst_34 [0] : vector<8x1xf32> to vector<1xf32>
    %95 = vector.shape_cast %94 : vector<1xf32> to vector<1x1xf32>
    %96 = arith.addf %93, %95 : vector<1x1xf32>
    %c0_35 = arith.constant 0 : index
    %c0_36 = arith.constant 0 : index
    %97 = vector.load %arg8[%c0_35, %c0_36] : memref<1x8xf32, #tpu.memory_space<vmem>>, vector<1x1xf32>
    tpu.vector_store %arg8[%c0_35, %c0_36], %96 {strides = array<i32>} : memref<1x8xf32, #tpu.memory_space<vmem>>, vector<1x1xf32>,
    %c0_37 = arith.constant 0 : index
    %c1 = arith.constant 1 : index
    %98 = vector.load %arg8[%c0_37, %c1] : memref<1x8xf32, #tpu.memory_space<vmem>>, vector<1x1xf32>
    %cst_38 = arith.constant dense<0.000000e+00> : vector<1xf32>
    %99 = vector.multi_reduction <add>, %78, %cst_38 [0] : vector<8x1xf32> to vector<1xf32>
    %100 = vector.shape_cast %99 : vector<1xf32> to vector<1x1xf32>
    %101 = arith.addf %98, %100 : vector<1x1xf32>
    %c0_39 = arith.constant 0 : index
    %c1_40 = arith.constant 1 : index
    %102 = vector.load %arg8[%c0_39, %c1_40] : memref<1x8xf32, #tpu.memory_space<vmem>>, vector<1x1xf32>
    tpu.vector_store %arg8[%c0_39, %c1_40], %101 {strides = array<i32>} : memref<1x8xf32, #tpu.memory_space<vmem>>, vector<1x1xf32>,
    %c0_41 = arith.constant 0 : index
    %c2 = arith.constant 2 : index
    %103 = vector.load %arg8[%c0_41, %c2] : memref<1x8xf32, #tpu.memory_space<vmem>>, vector<1x1xf32>
    %cst_42 = arith.constant dense<0.000000e+00> : vector<1xf32>
    %104 = vector.multi_reduction <add>, %28, %cst_42 [0] : vector<8x1xf32> to vector<1xf32>
    %105 = vector.shape_cast %104 : vector<1xf32> to vector<1x1xf32>
    %106 = arith.addf %103, %105 : vector<1x1xf32>
    %c0_43 = arith.constant 0 : index
    %c2_44 = arith.constant 2 : index
    %107 = vector.load %arg8[%c0_43, %c2_44] : memref<1x8xf32, #tpu.memory_space<vmem>>, vector<1x1xf32>
    tpu.vector_store %arg8[%c0_43, %c2_44], %106 {strides = array<i32>} : memref<1x8xf32, #tpu.memory_space<vmem>>, vector<1x1xf32>,
    %c0_45 = arith.constant 0 : index
    %c3 = arith.constant 3 : index
    %108 = vector.load %arg8[%c0_45, %c3] : memref<1x8xf32, #tpu.memory_space<vmem>>, vector<1x1xf32>
    %cst_46 = arith.constant dense<0.000000e+00> : vector<1xf32>
    %109 = vector.multi_reduction <add>, %66, %cst_46 [0] : vector<8x1xf32> to vector<1xf32>
    %110 = vector.shape_cast %109 : vector<1xf32> to vector<1x1xf32>
    %111 = arith.addf %108, %110 : vector<1x1xf32>
    %c0_47 = arith.constant 0 : index
    %c3_48 = arith.constant 3 : index
    %112 = vector.load %arg8[%c0_47, %c3_48] : memref<1x8xf32, #tpu.memory_space<vmem>>, vector<1x1xf32>
    tpu.vector_store %arg8[%c0_47, %c3_48], %111 {strides = array<i32>} : memref<1x8xf32, #tpu.memory_space<vmem>>, vector<1x1xf32>,
    %c0_49 = arith.constant 0 : index
    %c4 = arith.constant 4 : index
    %113 = vector.load %arg8[%c0_49, %c4] : memref<1x8xf32, #tpu.memory_space<vmem>>, vector<1x1xf32>
    %cst_50 = arith.constant dense<0.000000e+00> : vector<1xf32>
    %114 = vector.multi_reduction <add>, %85, %cst_50 [0] : vector<8x1xf32> to vector<1xf32>
    %115 = vector.shape_cast %114 : vector<1xf32> to vector<1x1xf32>
    %116 = arith.addf %113, %115 : vector<1x1xf32>
    %c0_51 = arith.constant 0 : index
    %c4_52 = arith.constant 4 : index
    %117 = vector.load %arg8[%c0_51, %c4_52] : memref<1x8xf32, #tpu.memory_space<vmem>>, vector<1x1xf32>
    tpu.vector_store %arg8[%c0_51, %c4_52], %116 {strides = array<i32>} : memref<1x8xf32, #tpu.memory_space<vmem>>, vector<1x1xf32>,
    %c0_53 = arith.constant 0 : index
    %c5 = arith.constant 5 : index
    %118 = vector.load %arg8[%c0_53, %c5] : memref<1x8xf32, #tpu.memory_space<vmem>>, vector<1x1xf32>
    %cst_54 = arith.constant dense<0.000000e+00> : vector<1xf32>
    %119 = vector.multi_reduction <add>, %92, %cst_54 [0] : vector<8x1xf32> to vector<1xf32>
    %120 = vector.shape_cast %119 : vector<1xf32> to vector<1x1xf32>
    %121 = arith.addf %118, %120 : vector<1x1xf32>
    %c0_55 = arith.constant 0 : index
    %c5_56 = arith.constant 5 : index
    %122 = vector.load %arg8[%c0_55, %c5_56] : memref<1x8xf32, #tpu.memory_space<vmem>>, vector<1x1xf32>
    tpu.vector_store %arg8[%c0_55, %c5_56], %121 {strides = array<i32>} : memref<1x8xf32, #tpu.memory_space<vmem>>, vector<1x1xf32>,
    %c0_i32_57 = arith.constant 0 : i32
    %123 = arith.cmpi eq, %arg0, %c0_i32_57 : i32
    %124 = arith.extui %123 : i1 to i32
    %c0_i32_58 = arith.constant 0 : i32
    %125 = arith.cmpi ne, %124, %c0_i32_58 : i32
    scf.if %125 {
      %c0_59 = arith.constant 0 : index
      %c0_60 = arith.constant 0 : index
      %126 = vector.load %arg8[%c0_59, %c0_60] : memref<1x8xf32, #tpu.memory_space<vmem>>, vector<1x8xf32>
      %127 = vector.extract_strided_slice %126 {offsets = [0, 0], sizes = [1, 1], strides = [1, 1]} : vector<1x8xf32> to vector<1x1xf32>
      %128 = vector.extract %127[0, 0] : f32 from vector<1x1xf32>
      %cst_61 = arith.constant 1.250000e-01 : f32
      %129 = arith.mulf %128, %cst_61 : f32
      %130 = vector.extract_strided_slice %126 {offsets = [0, 1], sizes = [1, 1], strides = [1, 1]} : vector<1x8xf32> to vector<1x1xf32>
      %131 = vector.extract %130[0, 0] : f32 from vector<1x1xf32>
      %cst_62 = arith.constant 1.250000e-01 : f32
      %132 = arith.mulf %131, %cst_62 : f32
      %133 = vector.extract_strided_slice %126 {offsets = [0, 2], sizes = [1, 1], strides = [1, 1]} : vector<1x8xf32> to vector<1x1xf32>
      %134 = vector.extract %133[0, 0] : f32 from vector<1x1xf32>
      %cst_63 = arith.constant 1.250000e-01 : f32
      %135 = arith.mulf %134, %cst_63 : f32
      %136 = vector.extract_strided_slice %126 {offsets = [0, 3], sizes = [1, 1], strides = [1, 1]} : vector<1x8xf32> to vector<1x1xf32>
      %137 = vector.extract %136[0, 0] : f32 from vector<1x1xf32>
      %cst_64 = arith.constant 1.250000e-01 : f32
      %138 = arith.mulf %137, %cst_64 : f32
      %139 = vector.extract_strided_slice %126 {offsets = [0, 4], sizes = [1, 1], strides = [1, 1]} : vector<1x8xf32> to vector<1x1xf32>
      %140 = vector.extract %139[0, 0] : f32 from vector<1x1xf32>
      %cst_65 = arith.constant 1.200000e+01 : f32
      %141 = arith.mulf %140, %cst_65 : f32
      %cst_66 = arith.constant 9.600000e+01 : f32
      %142 = arith.subf %141, %cst_66 : f32
      %cst_67 = arith.constant -438.177429 : f32
      %143 = arith.addf %142, %cst_67 : f32
      %144 = vector.extract_strided_slice %126 {offsets = [0, 5], sizes = [1, 1], strides = [1, 1]} : vector<1x8xf32> to vector<1x1xf32>
      %145 = vector.extract %144[0, 0] : f32 from vector<1x1xf32>
      %cst_68 = arith.constant 1.250000e-01 : f32
      %146 = arith.mulf %145, %cst_68 : f32
      %147 = arith.subf %143, %146 : f32
      %cst_69 = arith.constant 5.000000e-01 : f32
      %148 = arith.mulf %cst_69, %147 : f32
      %cst_70 = arith.constant 9.99999997E-7 : f32
      %149 = arith.mulf %cst_70, %148 : f32
      %150 = arith.addf %129, %149 : f32
      %c0_71 = arith.constant 0 : index
      %c0_72 = arith.constant 0 : index
      %151 = memref.load %arg7[%c0_71, %c0_72] : memref<1x4xf32, #tpu.memory_space<smem>>
      memref.store %150, %arg7[%c0_71, %c0_72] : memref<1x4xf32, #tpu.memory_space<smem>>
      %c0_73 = arith.constant 0 : index
      %c1_74 = arith.constant 1 : index
      %152 = memref.load %arg7[%c0_73, %c1_74] : memref<1x4xf32, #tpu.memory_space<smem>>
      memref.store %132, %arg7[%c0_73, %c1_74] : memref<1x4xf32, #tpu.memory_space<smem>>
      %c0_75 = arith.constant 0 : index
      %c2_76 = arith.constant 2 : index
      %153 = memref.load %arg7[%c0_75, %c2_76] : memref<1x4xf32, #tpu.memory_space<smem>>
      memref.store %135, %arg7[%c0_75, %c2_76] : memref<1x4xf32, #tpu.memory_space<smem>>
      %c0_77 = arith.constant 0 : index
      %c3_78 = arith.constant 3 : index
      %154 = memref.load %arg7[%c0_77, %c3_78] : memref<1x4xf32, #tpu.memory_space<smem>>
      memref.store %138, %arg7[%c0_77, %c3_78] : memref<1x4xf32, #tpu.memory_space<smem>>
    } else {
    }
    return
  }
  func.func @transform_0(%arg0: i32) -> (i32, i32) {
    %c0_i32 = arith.constant 0 : i32
    %c0_i32_0 = arith.constant 0 : i32
    return %arg0, %c0_i32 : i32, i32
  }
  func.func @transform_1(%arg0: i32) -> (i32, i32) {
    %c0_i32 = arith.constant 0 : i32
    %c0_i32_0 = arith.constant 0 : i32
    return %arg0, %c0_i32 : i32, i32
  }
  func.func @transform_2(%arg0: i32) -> (i32, i32) {
    %c0_i32 = arith.constant 0 : i32
    %c0_i32_0 = arith.constant 0 : i32
    return %arg0, %c0_i32 : i32, i32
  }
  func.func @transform_3(%arg0: i32) -> (i32, i32) {
    %c0_i32 = arith.constant 0 : i32
    %c0_i32_0 = arith.constant 0 : i32
    return %arg0, %c0_i32 : i32, i32
  }
  func.func @transform_4(%arg0: i32) -> (i32, i32) {
    %c0_i32 = arith.constant 0 : i32
    %c0_i32_0 = arith.constant 0 : i32
    return %arg0, %c0_i32 : i32, i32
  }
  func.func @transform_5(%arg0: i32) -> (i32, i32) {
    %c0_i32 = arith.constant 0 : i32
    %c0_i32_0 = arith.constant 0 : i32
    return %arg0, %c0_i32 : i32, i32
  }
  func.func @transform_6(%arg0: i32) -> (i32, i32) {
    %c0_i32 = arith.constant 0 : i32
    %c0_i32_0 = arith.constant 0 : i32
    %c0_i32_1 = arith.constant 0 : i32
    return %c0_i32, %c0_i32_0 : i32, i32
  }
}

</mosaic_0001>

<bundles_post_ra>
// kernel: tpu_custom_call.1
= control target key start
LH: loop header
LB: loop body
LE: loop exit
PB: predicated region body
PF: predicated region fallthrough
CT: control target
= control target key end

     0   :  { %11 = vsyncpa [#allocation4], 0  ;;  %s548_s0 = inlined_call_operand.hbm [shape: f32[8,32], index: 0, kind: input, shape index: {}]   ;;  %s549_s1 = inlined_call_operand.hbm [shape: f32[8,32], index: 1, kind: input, shape index: {}]   ;;  %s550_s2 = inlined_call_operand.hbm [shape: f32[8,32], index: 2, kind: input, shape index: {}]   ;;  %s551_s3 = inlined_call_operand.vmem [shape: f32[8,32], index: 3, kind: input, shape index: {}]   ;;  %s552_s4 = inlined_call_operand.hbm [shape: f32[8,32], index: 4, kind: input, shape index: {}]   ;;  %s553_s5 = inlined_call_operand.vmem [shape: f32[8,32], index: 5, kind: input, shape index: {}]   ;;  %s554_s6 = inlined_call_operand.hbm [shape: f32[1,4], index: 6, kind: output, shape index: {}]  }
   0x1   :  { %12 = vsyncpa [#allocation7], 0 }
   0x2   :  { %13 = vsyncpa [#allocation10], 0 }
   0x3   :  { %14 = vsyncpa [#allocation5], 0  ;;  %s430_s21 = smov [#allocation6]   ;;  %s431_s23 = smov [#allocation3]  }
   0x4   :  { %s31_s22 = sshll.u32 %s430_s21, 4  ;;  %s21_s24 = sshll.u32 %s431_s23, 4  ;;  %s32_s22 = int_to_ptr.vmem [resolvable:$true] %s31_s22  ;;  %s22_s24 = int_to_ptr.vmem [resolvable:$true] %s21_s24 }
   0x5   :  { %s324_s27 = scalar_lea.hbm %s549_s1, 128 }
   0x6   :  { %p325_p0 = scmp.ne.s32.totalorder %s549_s1, %s324_s27  ;;  %p328_p1 = scmp.lt.u32.totalorder %s324_s27, %s549_s1 }
   0x8   :  { %p330_p2 = pnand %p328_p1, %p325_p0 }
   0xa   :  { %333 = shalt.err (!%p330_p2)
}
   0xb   :  { %s334_s8 = scalar_lea.vmem %s32_s22, 128  ;;  %p339_p4 = scmp.lt.s32.totalorder %s32_s22, %s32_s22 }
   0xc   :  { %p335_p3 = scmp.ne.s32.totalorder %s32_s22, %s334_s8  ;;  %p340_p5 = scmp.lt.s32.totalorder %s334_s8, %s334_s8 }
   0xe   :  { %p341_p6 = por %p340_p5, %p339_p4 }
  0x10   :  { %p342_p7 = pnand %p341_p6, %p335_p3 }
  0x12   :  { %345 = shalt.err (!%p342_p7)
}
  0x13   :  { %34 = dma.hbm_to_vmem [thread:$0]  %s549_s1, 128, %s32_s22, [#allocation7]  }
  0x14   :  { %s346_s13 = scalar_lea.hbm %s548_s0, 128 }
  0x15   :  { %p347_p8 = scmp.ne.s32.totalorder %s548_s0, %s346_s13  ;;  %p350_p9 = scmp.lt.u32.totalorder %s346_s13, %s548_s0 }
  0x17   :  { %p352_p10 = pnand %p350_p9, %p347_p8 }
  0x19   :  { %355 = shalt.err (!%p352_p10)
}
  0x1a   :  { %s356_s18 = scalar_lea.vmem %s22_s24, 128  ;;  %p361_p12 = scmp.lt.s32.totalorder %s22_s24, %s22_s24 }
  0x1b   :  { %p357_p11 = scmp.ne.s32.totalorder %s22_s24, %s356_s18  ;;  %p362_p13 = scmp.lt.s32.totalorder %s356_s18, %s356_s18 }
  0x1d   :  { %p363_p0 = por %p362_p13, %p361_p12 }
  0x1f   :  { %p364_p1 = pnand %p363_p0, %p357_p11 }
  0x21   :  { %367 = shalt.err (!%p364_p1)
}
  0x22   :  { %24 = dma.hbm_to_vmem [thread:$0]  %s548_s0, 128, %s22_s24, [#allocation4]  }
  0x23   :  { %s432_s20 = smov [#allocation8]   ;;  %s433_s22 = smov [#allocation9]  }
  0x24   :  { %s41_s21 = sshll.u32 %s432_s20, 4  ;;  %s53_s23 = sshll.u32 %s433_s22, 4  ;;  %s42_s21 = int_to_ptr.vmem [resolvable:$true] %s41_s21  ;;  %s54_s23 = int_to_ptr.vmem [resolvable:$true] %s53_s23 }
  0x25   :  { %s368_s27 = scalar_lea.hbm %s550_s2, 128 }
  0x26   :  { %p369_p2 = scmp.ne.s32.totalorder %s550_s2, %s368_s27  ;;  %p372_p3 = scmp.lt.u32.totalorder %s368_s27, %s550_s2 }
  0x28   :  { %p374_p4 = pnand %p372_p3, %p369_p2 }
  0x2a   :  { %377 = shalt.err (!%p374_p4)
}
  0x2b   :  { %s378_s0 = scalar_lea.vmem %s42_s21, 128  ;;  %p383_p6 = scmp.lt.s32.totalorder %s42_s21, %s42_s21 }
  0x2c   :  { %p379_p5 = scmp.ne.s32.totalorder %s42_s21, %s378_s0  ;;  %p384_p7 = scmp.lt.s32.totalorder %s378_s0, %s378_s0 }
  0x2e   :  { %p385_p8 = por %p384_p7, %p383_p6 }
  0x30   :  { %p386_p9 = pnand %p385_p8, %p379_p5 }
  0x32   :  { %389 = shalt.err (!%p386_p9)
}
  0x33   :  { %44 = dma.hbm_to_vmem [thread:$0]  %s550_s2, 128, %s42_s21, [#allocation7]  }
  0x34   :  { %s390_s11 = scalar_lea.hbm %s552_s4, 128 }
  0x35   :  { %p391_p10 = scmp.ne.s32.totalorder %s552_s4, %s390_s11  ;;  %p394_p11 = scmp.lt.u32.totalorder %s390_s11, %s552_s4 }
  0x37   :  { %p396_p12 = pnand %p394_p11, %p391_p10 }
  0x39   :  { %399 = shalt.err (!%p396_p12)
}
  0x3a   :  { %s400_s16 = scalar_lea.vmem %s54_s23, 128  ;;  %p405_p0 = scmp.lt.s32.totalorder %s54_s23, %s54_s23 }
  0x3b   :  { %p401_p13 = scmp.ne.s32.totalorder %s54_s23, %s400_s16  ;;  %p406_p1 = scmp.lt.s32.totalorder %s400_s16, %s400_s16 }
  0x3d   :  { %p407_p2 = por %p406_p1, %p405_p0 }
  0x3f   :  { %p408_p3 = pnand %p407_p2, %p401_p13 }
  0x41   :  { %411 = shalt.err (!%p408_p3)
}
  0x42   :  { %56 = dma.hbm_to_vmem [thread:$0]  %s552_s4, 128, %s54_s23, [#allocation10]  }
  0x43   :  { %422 = dma.done.wait [#allocation4], 128  }
  0x44   :  { %423 = vsyncadd [#allocation4], 4294967168 }
  0x45   :  { %424 = dma.done.wait [#allocation7], 256  }
  0x46   :  { %425 = vsyncadd [#allocation7], 4294967040 }
  0x47   :  { %426 = dma.done.wait [#allocation10], 128  }
  0x48   :  { %427 = vsyncadd [#allocation10], 4294967168  ;;  %v77_v0 = vld [vmem:[#allocation3] sm:$0xff]  ;;  %v78_v1 = vld [vmem:[#allocation6] sm:$0xff]  ;;  %vm89_vm0 = vcmask 261120   ;;  %vm75_vm1 = vcmask 57344  }
  0x49   :  { %v79_v2 = vld [vmem:[#allocation8] sm:$0xff]  ;;  %v80_v3 = vld [vmem:[%s551_s3] sm:$0xff]  ;;  %v83_v6 = vmul.f32 %v77_v0, %v77_v0  ;;  %v84_v7 = vmul.f32 %v78_v1, %v78_v1  ;;  %v123_v25 = vmul.f32 4.0, %v77_v0  ;;  %v434_v54 = vmov 0.0   ;;  %s435_s3 = smov 126   ;;  %s436_s4 = smov 127  }
  0x4a   :  { %v81_v4 = vld [vmem:[#allocation9] sm:$0xff]  ;;  %v85_v8 = vmul.f32 %v79_v2, %v79_v2  ;;  %v129_v24 = vmul.f32 %v79_v2, %v78_v1  ;;  %310 = vlog2.f32 %v80_v3  ;;  %v100_v30 = vsub.f32 %v78_v1, %v79_v2  ;;  %76 = vst.msk [vmem:[#allocation2] sm:$0x1] %vm75_vm1, %v434_v54  ;;  %s438_s21 = smov 123   ;;  %s439_s22 = smov 124  }
  0x4b   :  { %v82_v5 = vld [vmem:[%s553_s5] sm:$0xff]  ;;  %v107_v9 = vmul.f32 %v81_v4, %v81_v4  ;;  %v124_v11 = vmul.f32 %v81_v4, %v78_v1  ;;  %v86_v13 = vadd.f32 %v83_v6, %v80_v3  ;;  %v87_v14 = vadd.f32 %v84_v7, %v81_v4  ;;  %s437_s5 = smov 125   ;;  %s412_s17 = scalar_lea.hbm %s554_s6, 16 }
  0x4c   :  { %v108_v10 = vmul.f32 %v82_v5, %v82_v5  ;;  %v125_v12 = vmul.f32 %v82_v5, %v79_v2  ;;  %v88_v15 = vadd.f32 %v85_v8, %v82_v5  ;;  %v110_v16 = vmul.f32 %v84_v7, %v81_v4  ;;  %p413_p4 = scmp.ne.s32.totalorder %s554_s6, %s412_s17  ;;  %p416_p5 = scmp.lt.u32.totalorder %s412_s17, %s554_s6 }
  0x4d   :  { %v111_v17 = vmul.f32 %v85_v8, %v82_v5  ;;  %v115_v19 = vmul.f32 2.0, %v86_v13  ;;  %v119_v21 = vmul.f32 2.0, %v83_v6  ;;  %v120_v23 = vadd.f32 %v85_v8, %v84_v7 }
  0x4e   :  { %v109_v18 = vadd.f32 %v108_v10, %v107_v9  ;;  %v116_v20 = vadd.f32 %v88_v15, %v87_v14  ;;  %v126_v26 = vadd.f32 %v125_v12, %v124_v11  ;;  %v93_v27 = vsel %vm89_vm0, %v88_v15, 0.0  ;;  %p418_p6 = pnand %p416_p5, %p413_p4 }
  0x4f   :  { %v112_v22 = vadd.f32 %v111_v17, %v110_v16  ;;  %94 = vadd.xlane.f32.xlu1 %v93_v27  ;;  %312 = vlog2.f32 %v81_v4  ;;  %v121_v32 = vmul.f32 %v120_v23, %v119_v21  ;;  %v130_v33 = vmul.f32 4.0, %v129_v24 }
  0x50   :  { %v117_v29 = vmul.f32 %v116_v20, %v115_v19  ;;  %314 = vlog2.f32 %v82_v5  ;;  %v101_v34 = vmul.f32 %v100_v30, %v77_v0  ;;  %v127_v36 = vmul.f32 %v126_v26, %v123_v25 }
  0x51   :  { %v113_v28 = vmul.f32 2.0, %v112_v22  ;;  %v131_v39 = vmul.f32 %v130_v33, %v80_v3  ;;  %v90_v50 = vsel %vm89_vm0, %v87_v14, 0.0  ;;  %v96_v53 = vsel %vm89_vm0, %v86_v13, 0.0 }
  0x52   :  { %v102_v37 = vsel %vm89_vm0, %v101_v34, 0.0  ;;  %vm178_vm4 = vcmask 0   ;;  %vm188_vm5 = vcmask 8200   ;;  %vm198_vm6 = vcmask 16400  }
  0x53   :  { %v114_v31 = vadd.f32 %v113_v28, %v109_v18  ;;  %103 = vadd.xlane.f32.xlu1 %v102_v37  ;;  %v170_v28 = vld [vmem:[#allocation2] sm:$0x1]  ;;  %vm208_vm7 = vcmask 24600   ;;  %vm218_vm8 = vcmask 32800   ;;  %vm228_vm9 = vcmask 41000  }
  0x54   :  { %v311_v40 = vpop.eup %310 }
  0x55   :  { %v118_v35 = vadd.f32 %v117_v29, %v114_v31  ;;  %v160_v42 = vmul.f32 0.6931472, %v311_v40 }
  0x57   :  { %v122_v38 = vsub.f32 %v118_v35, %v121_v32 }
  0x59   :  { %v128_v41 = vsub.f32 %v122_v38, %v127_v36  ;;  %v313_v43 = vpop.eup %312 }
  0x5a   :  { %v315_v45 = vpop.eup %314  ;;  %v162_v46 = vmul.f32 0.6931472, %v313_v43 }
  0x5b   :  { %v132_v44 = vsub.f32 %v128_v41, %v131_v39  ;;  %v165_v48 = vmul.f32 0.6931472, %v315_v45 }
  0x5c   :  { %v163_v49 = vadd.f32 %v162_v46, %v160_v42 }
  0x5d   :  { %v133_v47 = vsel %vm89_vm0, %v132_v44, 0.0 }
  0x5e   :  { %134 = vadd.xlane.f32.xlu0 %v133_v47  ;;  %v166_v51 = vadd.f32 %v165_v48, %v163_v49 }
  0x60   :  { %v167_v52 = vsel %vm89_vm0, %v166_v51, 0.0 }
  0x61   :  { %168 = vadd.xlane.f32.xlu1 %v167_v52 }
  0x62   :  { %91 = vadd.xlane.f32.xlu0 %v90_v50 }
  0x66   :  { %97 = vadd.xlane.f32.xlu0 %v96_v53 }
  0xdc   :  { %v95_v61 = vpop.xlane.xlu1 %94 }
  0xe0   :  { %v104_v5 = vpop.xlane.xlu1 %103 }
  0xe1   :  { %v105_v7 = vmul.f32 2.0, %v104_v5 }
  0xeb   :  { %v135_v55 = vpop.xlane.xlu0 %134 }
  0xec   :  { %v136_v56 = vmul.f32 2.0, %v135_v55 }
  0xee   :  { %v137_v57 = vadd.f32 1e-07, %v136_v56  ;;  %v169_v51 = vpop.xlane.xlu1 %168 }
  0xef   :  { %v92_v58 = vpop.xlane.xlu0 %91  ;;  %v221_v54 = vrot.slane %v169_v51, 4 }
  0xf0   :  { %316 = vrsqrt.f32 %v137_v57  ;;  %vm140_vm2 = vcmp.eq.f32.partialorder %v137_v57, inf  ;;  %v143_v1 = vand.u32 2147483648, %v137_v57  ;;  %vm142_vm3 = vcmp.eq.f32.partialorder %v137_v57, 0.0 }
  0xf1   :  { %v99_v6 = vsub.f32 %v92_v58, %v95_v61 }
  0xf3   :  { %v98_v59 = vpop.xlane.xlu0 %97  ;;  %v106_v8 = vsub.f32 %v99_v6, %v105_v7 }
  0xf4   :  { %v157_v60 = vadd.f32 %v98_v59, %v92_v58  ;;  %v222_v58 = vadd.f32 %v221_v54, %v169_v51 }
  0xf5   :  { %v145_v9 = vsub.f32 0.0, %v106_v8  ;;  %v191_v30 = vrot.slane %v106_v8, 4 }
  0xf6   :  { %v158_v62 = vadd.f32 %v157_v60, %v95_v61  ;;  %v223_v60 = vrot.slane %v222_v58, 2 }
  0xf7   :  { %v192_v33 = vadd.f32 %v191_v30, %v106_v8 }
  0xf8   :  { %v211_v44 = vrot.slane %v158_v62, 4 }
  0xf9   :  { %v193_v35 = vrot.slane %v192_v33, 2 }
  0xfa   :  { %v317_v63 = vpop.eup %316  ;;  %v212_v49 = vadd.f32 %v211_v44, %v158_v62 }
  0xfb   :  { %v139_v0 = vmul.f32 %v317_v63, %v137_v57  ;;  %v194_v40 = vadd.f32 %v193_v35, %v192_v33 }
  0xfc   :  { %v213_v52 = vrot.slane %v212_v49, 2 }
  0xfd   :  { %v141_v2 = vsel %vm140_vm2, %v137_v57, %v139_v0  ;;  %v195_v42 = vrot.slane %v194_v40, 1 }
  0xfe   :  { %v144_v3 = vsel %vm142_vm3, %v143_v1, %v141_v2  ;;  %v214_v56 = vadd.f32 %v213_v52, %v212_v49  ;;  %v224_v1 = vadd.f32 %v223_v60, %v222_v58 }
  0xff   :  { %v146_v4 = vadd.f32 1e-08, %v144_v3  ;;  %v201_v36 = vrot.slane %v144_v3, 4  ;;  %v196_v45 = vadd.f32 %v195_v42, %v194_v40 }
 0x100   :  { %v215_v59 = vrot.slane %v214_v56, 1  ;;  %v225_v62 = vrot.slane %v224_v1, 1 }
 0x101   :  { %318 = vrcp.f32 %v146_v4  ;;  %v202_v41 = vadd.f32 %v201_v36, %v144_v3 }
 0x102   :  { %v216_v61 = vadd.f32 %v215_v59, %v214_v56  ;;  %v226_v2 = vadd.f32 %v225_v62, %v224_v1 }
 0x103   :  { %v203_v43 = vrot.slane %v202_v41, 2 }
 0x105   :  { %v204_v47 = vadd.f32 %v203_v43, %v202_v41 }
 0x107   :  { %v205_v50 = vrot.slane %v204_v47, 1 }
 0x109   :  { %v206_v53 = vadd.f32 %v205_v50, %v204_v47 }
 0x10b   :  { %v319_v10 = vpop.eup %318 }
 0x10c   :  { %v148_v11 = vmul.f32 %v319_v10, %v145_v9 }
 0x10e   :  { %v149_v12 = vmul.f32 0.70710677, %v148_v11 }
 0x110   :  { %320 = verf.f32 %v149_v12 }
 0x11a   :  { %v321_v13 = vpop.eup %320 }
 0x11b   :  { %v151_v14 = vadd.f32 1.0, %v321_v13 }
 0x11d   :  { %v152_v15 = vmul.f32 0.5, %v151_v14 }
 0x11f   :  { %v153_v16 = vadd.f32 1e-08, %v152_v15  ;;  %v181_v21 = vrot.slane %v152_v15, 4 }
 0x121   :  { %322 = vlog2.f32 %v153_v16  ;;  %v182_v24 = vadd.f32 %v181_v21, %v152_v15 }
 0x123   :  { %v183_v27 = vrot.slane %v182_v24, 2 }
 0x125   :  { %v184_v32 = vadd.f32 %v183_v27, %v182_v24 }
 0x127   :  { %v185_v34 = vrot.slane %v184_v32, 1 }
 0x129   :  { %v186_v37 = vadd.f32 %v185_v34, %v184_v32 }
 0x12b   :  { %v323_v17 = vpop.eup %322 }
 0x12c   :  { %v155_v18 = vmul.f32 0.6931472, %v323_v17 }
 0x12e   :  { %v156_v19 = vsub.f32 0.0, %v155_v18 }
 0x130   :  { %v171_v20 = vrot.slane %v156_v19, 4 }
 0x132   :  { %v172_v22 = vadd.f32 %v171_v20, %v156_v19 }
 0x134   :  { %v173_v23 = vrot.slane %v172_v22, 2 }
 0x136   :  { %v174_v25 = vadd.f32 %v173_v23, %v172_v22 }
 0x138   :  { %v175_v26 = vrot.slane %v174_v25, 1 }
 0x13a   :  { %v176_v29 = vadd.f32 %v175_v26, %v174_v25 }
 0x13c   :  { %v177_v31 = vadd.f32 %v176_v29, %v170_v28 }
 0x13e   :  { %179 = vst.msk [vmem:[#allocation2] sm:$0x1] %vm178_vm4, %v177_v31 }
 0x145   :  { %v180_v38 = vld [vmem:[#allocation2] sm:$0x1] }
 0x146   :  { %v187_v39 = vadd.f32 %v186_v37, %v180_v38 }
 0x148   :  { %189 = vst.msk [vmem:[#allocation2] sm:$0x1] %vm188_vm5, %v187_v39 }
 0x14f   :  { %v190_v46 = vld [vmem:[#allocation2] sm:$0x1] }
 0x150   :  { %v197_v48 = vadd.f32 %v196_v45, %v190_v46 }
 0x152   :  { %199 = vst.msk [vmem:[#allocation2] sm:$0x1] %vm198_vm6, %v197_v48 }
 0x159   :  { %v200_v55 = vld [vmem:[#allocation2] sm:$0x1] }
 0x15a   :  { %v207_v57 = vadd.f32 %v206_v53, %v200_v55 }
 0x15c   :  { %209 = vst.msk [vmem:[#allocation2] sm:$0x1] %vm208_vm7, %v207_v57 }
 0x163   :  { %v210_v63 = vld [vmem:[#allocation2] sm:$0x1] }
 0x164   :  { %v217_v0 = vadd.f32 %v216_v61, %v210_v63 }
 0x166   :  { %219 = vst.msk [vmem:[#allocation2] sm:$0x1] %vm218_vm8, %v217_v0 }
 0x16d   :  { %v220_v3 = vld [vmem:[#allocation2] sm:$0x1] }
 0x16e   :  { %v227_v4 = vadd.f32 %v226_v2, %v220_v3 }
 0x170   :  { %229 = vst.msk [vmem:[#allocation2] sm:$0x1] %vm228_vm9, %v227_v4 }
 0x177   :  { %v233_v5 = vld [vmem:[#allocation2] sm:$0x1] }
 0x178   :  { %240 = vrot.lane.b32.xlu1 %v233_v5, %s435_s3  ;;  %236 = vrot.lane.b32.xlu0 %v233_v5, %s436_s4  ;;  %287 = vpush %v233_v5 }
 0x17c   :  { %244 = vrot.lane.b32.xlu1 %v233_v5, %s437_s5  ;;  %254 = vrot.lane.b32.xlu0 %v233_v5, %s438_s21 }
 0x180   :  { %248 = vrot.lane.b32.xlu1 %v233_v5, %s439_s22 }
 0x1a9   :  { %s288_s23 = spop %287 }
 0x1aa   :  { %s235_s13 = smul.f32 0.125, %s288_s23 }
 0x1ea   :  { %v241_v6 = vpop.permute.xlu1 %240  ;;  %v237_v7 = vpop.permute.xlu0 %236 }
 0x1eb   :  { %289 = vpush %v237_v7 }
 0x1ec   :  { %291 = vpush %v241_v6 }
 0x1ee   :  { %v245_v8 = vpop.permute.xlu1 %244  ;;  %v255_v10 = vpop.permute.xlu0 %254 }
 0x1ef   :  { %293 = vpush %v245_v8 }
 0x1f2   :  { %v249_v9 = vpop.permute.xlu1 %248 }
 0x1f3   :  { %295 = vpush %v249_v9 }
 0x1f4   :  { %297 = vpush %v255_v10 }
 0x21c   :  { %s290_s25 = spop %289 }
 0x21d   :  { %s239_s26 = smul.f32 0.125, %s290_s25  ;;  %s292_s27 = spop %291 }
 0x21e   :  { %s243_s28 = smul.f32 0.125, %s292_s27 }
 0x21f   :  { %265 = sst [smem:[#allocation11 + $0x1]] %s239_s26 }
 0x220   :  { %267 = sst [smem:[#allocation11 + $0x2]] %s243_s28  ;;  %s294_s29 = spop %293 }
 0x221   :  { %s247_s30 = smul.f32 0.125, %s294_s29 }
 0x223   :  { %269 = sst [smem:[#allocation11 + $0x3]] %s247_s30 }
 0x224   :  { %s296_s7 = spop %295 }
 0x225   :  { %s251_s0 = smul.f32 12.0, %s296_s7  ;;  %s298_s24 = spop %297 }
 0x226   :  { %s257_s10 = smul.f32 0.125, %s298_s24 }
 0x227   :  { %s286_s8 = sadd.f32 -96.0, %s251_s0 }
 0x229   :  { %s253_s9 = sadd.f32 -438.17743, %s286_s8 }
 0x22b   :  { %s258_s11 = ssub.f32 %s253_s9, %s257_s10 }
 0x22d   :  { %s259_s12 = smul.f32 0.5, %s258_s11 }
 0x22f   :  { %s260_s14 = smul.f32 1e-06, %s259_s12 }
 0x231   :  { %s261_s15 = sadd.f32 %s260_s14, %s235_s13 }
 0x233   :  { %263 = sst [smem:[#allocation11]] %s261_s15 }
 0x234   :  { %421 = shalt.err (!%p418_p6)
}
 0x235   :  { %s440_s3 = smov [#allocation11]  }
 0x236   :  { %277 = dma.smem_to_hbm %s440_s3, 16, %s554_s6, [#allocation5]  }
 0x237   :  { %428 = dma.done.wait [#allocation5], 16  }
 0x238   :  { %429 = vsyncadd [#allocation5], 4294967280 }
 0x239   :  { %281 = sfence }
 0x23a   :  { %282 = vsyncpa [#allocation4], 1 }
 0x23b   :  { %283 = vsyncpa [#allocation7], 1 }
 0x23c   :  { %284 = vsyncpa [#allocation10], 1 }
 0x23d   :  { %285 = vsyncpa [#allocation5], 1 }

</bundles_post_ra>
